<compile_context>
chip_gen: v7x
topology: tpu7x:2x2x1
jax: 0.10.0
libtpu: 0.0.40
codegen_flags: <defaults>
</compile_context>

<pallas_src>
import functools

import jax
import jax.numpy as jnp
from jax.experimental import pallas as pl
from jax.experimental.pallas import tpu as pltpu

LANE = 128
SUBLANE = 8


def _round_up(n, m):
    return ((n + m - 1) // m) * m


def _pad2(a, rows, cols):
    return jnp.pad(a, ((0, rows - a.shape[0]), (0, cols - a.shape[1])))


def _pad1(a, n):
    return jnp.pad(a, (0, n - a.shape[0]))


def _default_min_grid_steps():
    # v7x has 2 TensorCores per chip; make sure the 'parallel' batch axis has
    # at least 2 grid steps there.  Single-TC v5e/v6e: just maximize the tile.
    try:
        kind = jax.devices()[0].device_kind.lower()
        return 2 if "v7" in kind else 1
    except Exception:  # pragma: no cover - defensive
        return 1


def _dqn_kernel(x_ref, w1_ref, w2_ref, w3_ref, b_ref, o_ref, *, ph, po):
    b = b_ref[...]                                   # (3, PB) f32
    x = x_ref[...].astype(jnp.bfloat16)              # cast in-kernel (VPU), K unpadded
    # layer 1: Linear(inp, hid) + ReLU   (bf16 MXU, f32 accumulate)
    h1 = jnp.dot(x, w1_ref[...], preferred_element_type=jnp.float32)
    h1 = jnp.maximum(h1 + b[0, :ph], 0.0)
    # layer 2: Linear(hid, hid) + ReLU
    h2 = jnp.dot(h1.astype(jnp.bfloat16), w2_ref[...],
                 preferred_element_type=jnp.float32)
    h2 = jnp.maximum(h2 + b[1, :ph], 0.0)
    # layer 3: Linear(hid, out)  -> lane-dense bf16 store (padded cols are 0)
    o = jnp.dot(h2.astype(jnp.bfloat16), w3_ref[...],
                preferred_element_type=jnp.float32)
    o_ref[...] = (o + b[2, :po]).astype(o_ref.dtype)


def prepare_params(params):
    """Pad/cast the weights once; store them for reuse across forward calls."""
    w1, b1, w2, b2, w3, b3 = params
    inp, hid = w1.shape
    out = w3.shape[1]
    ph = _round_up(hid, LANE)
    po = _round_up(out, LANE)
    pb = max(ph, po)
    return {
        "w1": _pad2(w1, inp, ph).astype(jnp.bfloat16),   # (inp, PH), K unpadded
        "w2": _pad2(w2, ph, ph).astype(jnp.bfloat16),    # (PH, PH)
        "w3": _pad2(w3, ph, po).astype(jnp.bfloat16),    # (PH, PO)
        "b": jnp.stack([
            _pad1(b1.reshape(-1).astype(jnp.float32), pb),
            _pad1(b2.reshape(-1).astype(jnp.float32), pb),
            _pad1(b3.reshape(-1).astype(jnp.float32), pb),
        ]),                                              # (3, PB) f32
        "inp": inp, "hid": hid, "out": out,
        "ph": ph, "po": po, "pb": pb,
    }


def dqn_forward(x, prep, *, tb=2048, min_grid_steps=None):
    """y = relu(relu(x@W1+b1)@W2+b2)@W3+b3 using pre-padded bf16 weights."""
    B, inp = x.shape
    assert inp == prep["inp"], (inp, prep["inp"])
    ph, po, pb, out = prep["ph"], prep["po"], prep["pb"], prep["out"]

    if min_grid_steps is None:
        min_grid_steps = _default_min_grid_steps()

    # Batch tile: multiple of 8 sublanes, capped at `tb`; on multi-TC chips
    # additionally capped so the grid has >= min_grid_steps steps.
    tile = min(tb, _round_up(B, SUBLANE))
    if min_grid_steps > 1 and B > SUBLANE:
        tile = min(tile, _round_up(-(-B // min_grid_steps), SUBLANE))
    tile = max(SUBLANE, (tile // SUBLANE) * SUBLANE)
    bp = _round_up(B, tile)

    # Only pad the batch dim (and only when needed); feature dim stays inp.
    xp = x if bp == B else jnp.pad(x, ((0, bp - B), (0, 0)))

    flops = 2 * bp * (inp * ph + ph * ph + ph * po)
    bytes_accessed = (bp * inp * 4                       # x read (f32, unpadded K)
                      + (inp * ph + ph * ph + ph * po) * 2   # bf16 weights, once
                      + 3 * pb * 4                        # stacked biases
                      + bp * po * 2)                      # bf16 output writeback

    kernel = functools.partial(_dqn_kernel, ph=ph, po=po)

    out_padded = pl.pallas_call(
        kernel,
        out_shape=jax.ShapeDtypeStruct((bp, po), jnp.bfloat16),
        grid=(bp // tile,),
        in_specs=[
            pl.BlockSpec((tile, inp), lambda i: (i, 0)),  # x tile (pipelined)
            pl.BlockSpec((inp, ph), lambda i: (0, 0)),    # W1, VMEM-resident
            pl.BlockSpec((ph, ph), lambda i: (0, 0)),     # W2, VMEM-resident
            pl.BlockSpec((ph, po), lambda i: (0, 0)),     # W3, VMEM-resident
            pl.BlockSpec((3, pb), lambda i: (0, 0)),      # stacked biases
        ],
        out_specs=pl.BlockSpec((tile, po), lambda i: (i, 0)),
        compiler_params=pltpu.CompilerParams(
            dimension_semantics=("parallel",)),
        cost_estimate=pl.CostEstimate(
            flops=flops, transcendentals=0, bytes_accessed=bytes_accessed),
    )(xp, prep["w1"], prep["w2"], prep["w3"], prep["b"])

    # Tiny (B, out) slice; cast back to f32 to match the module's output dtype.
    return out_padded[:B, :out].astype(jnp.float32)


def init_params(key, inp, hid, out):
    """Deterministic init mimicking PyTorch's default Linear init
    (uniform(-1/sqrt(fan_in), 1/sqrt(fan_in))); weights stored (in, out)."""
    ks = jax.random.split(key, 6)

    def lin(kw, kb, fan_in, fan_out):
        bound = 1.0 / float(fan_in) ** 0.5
        w = jax.random.uniform(kw, (fan_in, fan_out), jnp.float32, -bound, bound)
        b = jax.random.uniform(kb, (fan_out,), jnp.float32, -bound, bound)
        return w, b

    w1, b1 = lin(ks[0], ks[1], inp, hid)
    w2, b2 = lin(ks[2], ks[3], hid, hid)
    w3, b3 = lin(ks[4], ks[5], hid, out)
    return (w1, b1, w2, b2, w3, b3)


def dqn_reference(x, params):
    w1, b1, w2, b2, w3, b3 = params
    h1 = jnp.maximum(x @ w1 + b1, 0.0)
    h2 = jnp.maximum(h1 @ w2 + b2, 0.0)
    return h2 @ w3 + b3


if __name__ == "__main__":
    # DQN over a low-dim state: inp=4, hid=32, out=2 actions, batch=8.
    B, INP, HID, OUT = 8, 4, 32, 2

    key = jax.random.PRNGKey(0)
    kx, kp = jax.random.split(key)
    x = jax.random.normal(kx, (B, INP), jnp.float32)
    params = init_params(kp, INP, HID, OUT)

    prep = prepare_params(params)          # pad/cast weights once, reuse per step
    out = jax.block_until_ready(dqn_forward(x, prep))

    # Reference over the same bf16-quantized x / weights the kernel uses
    # (biases stay f32); tolerance covers the bf16 output writeback rounding.
    q = lambda a: a.astype(jnp.bfloat16).astype(jnp.float32)
    w1, b1, w2, b2, w3, b3 = params
    ref = dqn_reference(q(x), (q(w1), b1, q(w2), b2, q(w3), b3))

    assert out.shape == (B, OUT), out.shape
    assert jnp.allclose(out, ref, atol=2e-2, rtol=2e-2), "mismatch vs reference"
    print("KERNEL_OK")
</pallas_src>

<mosaic_0001>
module attributes {stable_mosaic.version = 11 : i64} {
  func.func @_dqn_kernel(%arg0: i32, %arg1: memref<8x4xf32, #tpu.memory_space<vmem>>, %arg2: memref<4x128xbf16, #tpu.memory_space<vmem>>, %arg3: memref<128x128xbf16, #tpu.memory_space<vmem>>, %arg4: memref<128x128xbf16, #tpu.memory_space<vmem>>, %arg5: memref<3x128xf32, #tpu.memory_space<vmem>>, %arg6: memref<8x128xbf16, #tpu.memory_space<vmem>>) attributes {dimension_semantics = [#tpu.dimension_semantics<parallel>], iteration_bounds = array<i64: 1>, scalar_prefetch = 0 : i64, scratch_operands = 0 : i64, tpu.core_type = #tpu.core_type<tc>, window_params = [{transform_indices = @transform_0, window_bounds = array<i64: 8, 4>}, {pipeline_mode = #tpu.pipeline_mode<synchronous>, transform_indices = @transform_1, window_bounds = array<i64: 4, 128>}, {pipeline_mode = #tpu.pipeline_mode<synchronous>, transform_indices = @transform_2, window_bounds = array<i64: 128, 128>}, {pipeline_mode = #tpu.pipeline_mode<synchronous>, transform_indices = @transform_3, window_bounds = array<i64: 128, 128>}, {pipeline_mode = #tpu.pipeline_mode<synchronous>, transform_indices = @transform_4, window_bounds = array<i64: 3, 128>}, {transform_indices = @transform_5, window_bounds = array<i64: 8, 128>}]} {
    %c0 = arith.constant 0 : index
    %c0_0 = arith.constant 0 : index
    %0 = vector.load %arg5[%c0, %c0_0] : memref<3x128xf32, #tpu.memory_space<vmem>>, vector<3x128xf32>
    %c0_1 = arith.constant 0 : index
    %c0_2 = arith.constant 0 : index
    %1 = vector.load %arg1[%c0_1, %c0_2] : memref<8x4xf32, #tpu.memory_space<vmem>>, vector<8x4xf32>
    %2 = arith.truncf %1 : vector<8x4xf32> to vector<8x4xbf16>
    %c0_3 = arith.constant 0 : index
    %c0_4 = arith.constant 0 : index
    %3 = vector.load %arg2[%c0_3, %c0_4] : memref<4x128xbf16, #tpu.memory_space<vmem>>, vector<4x128xbf16>
    %cst = arith.constant dense<0.000000e+00> : vector<8x128xf32>
    %4 = tpu.matmul %2, %3, %cst {dimension_numbers = #tpu.dot_dimension_numbers<[1], [0], [0], [1], [0, 0, 1, 1], [], []>} : vector<8x4xbf16>, vector<4x128xbf16>, vector<8x128xf32> -> vector<8x128xf32>
    %5 = vector.extract_strided_slice %0 {offsets = [0, 0], sizes = [1, 128], strides = [1, 1]} : vector<3x128xf32> to vector<1x128xf32>
    %6 = vector.shape_cast %5 : vector<1x128xf32> to vector<128xf32>
    %7 = vector.shape_cast %6 : vector<128xf32> to vector<1x128xf32>
    %8 = vector.broadcast %7 : vector<1x128xf32> to vector<8x128xf32>
    %9 = arith.addf %4, %8 : vector<8x128xf32>
    %cst_5 = arith.constant 0.000000e+00 : f32
    %10 = vector.broadcast %cst_5 : f32 to vector<8x128xf32>
    %11 = arith.maximumf %9, %10 : vector<8x128xf32>
    %12 = arith.truncf %11 : vector<8x128xf32> to vector<8x128xbf16>
    %c0_6 = arith.constant 0 : index
    %c0_7 = arith.constant 0 : index
    %13 = vector.load %arg3[%c0_6, %c0_7] : memref<128x128xbf16, #tpu.memory_space<vmem>>, vector<128x128xbf16>
    %cst_8 = arith.constant dense<0.000000e+00> : vector<8x128xf32>
    %14 = tpu.matmul %12, %13, %cst_8 {dimension_numbers = #tpu.dot_dimension_numbers<[1], [0], [0], [1], [0, 0, 1, 1], [], []>} : vector<8x128xbf16>, vector<128x128xbf16>, vector<8x128xf32> -> vector<8x128xf32>
    %15 = vector.extract_strided_slice %0 {offsets = [1, 0], sizes = [1, 128], strides = [1, 1]} : vector<3x128xf32> to vector<1x128xf32>
    %16 = vector.shape_cast %15 : vector<1x128xf32> to vector<128xf32>
    %17 = vector.shape_cast %16 : vector<128xf32> to vector<1x128xf32>
    %18 = vector.broadcast %17 : vector<1x128xf32> to vector<8x128xf32>
    %19 = arith.addf %14, %18 : vector<8x128xf32>
    %cst_9 = arith.constant 0.000000e+00 : f32
    %20 = vector.broadcast %cst_9 : f32 to vector<8x128xf32>
    %21 = arith.maximumf %19, %20 : vector<8x128xf32>
    %22 = arith.truncf %21 : vector<8x128xf32> to vector<8x128xbf16>
    %c0_10 = arith.constant 0 : index
    %c0_11 = arith.constant 0 : index
    %23 = vector.load %arg4[%c0_10, %c0_11] : memref<128x128xbf16, #tpu.memory_space<vmem>>, vector<128x128xbf16>
    %cst_12 = arith.constant dense<0.000000e+00> : vector<8x128xf32>
    %24 = tpu.matmul %22, %23, %cst_12 {dimension_numbers = #tpu.dot_dimension_numbers<[1], [0], [0], [1], [0, 0, 1, 1], [], []>} : vector<8x128xbf16>, vector<128x128xbf16>, vector<8x128xf32> -> vector<8x128xf32>
    %25 = vector.extract_strided_slice %0 {offsets = [2, 0], sizes = [1, 128], strides = [1, 1]} : vector<3x128xf32> to vector<1x128xf32>
    %26 = vector.shape_cast %25 : vector<1x128xf32> to vector<128xf32>
    %27 = vector.shape_cast %26 : vector<128xf32> to vector<1x128xf32>
    %28 = vector.broadcast %27 : vector<1x128xf32> to vector<8x128xf32>
    %29 = arith.addf %24, %28 : vector<8x128xf32>
    %30 = arith.truncf %29 : vector<8x128xf32> to vector<8x128xbf16>
    %c0_13 = arith.constant 0 : index
    %c0_14 = arith.constant 0 : index
    %31 = vector.load %arg6[%c0_13, %c0_14] : memref<8x128xbf16, #tpu.memory_space<vmem>>, vector<8x128xbf16>
    tpu.vector_store %arg6[%c0_13, %c0_14], %30 {strides = array<i32>} : memref<8x128xbf16, #tpu.memory_space<vmem>>, vector<8x128xbf16>,
    return
  }
  func.func @transform_0(%arg0: i32) -> (i32, i32) {
    %c0_i32 = arith.constant 0 : i32
    %c0_i32_0 = arith.constant 0 : i32
    return %arg0, %c0_i32 : i32, i32
  }
  func.func @transform_1(%arg0: i32) -> (i32, i32) {
    %c0_i32 = arith.constant 0 : i32
    %c0_i32_0 = arith.constant 0 : i32
    %c0_i32_1 = arith.constant 0 : i32
    return %c0_i32, %c0_i32_0 : i32, i32
  }
  func.func @transform_2(%arg0: i32) -> (i32, i32) {
    %c0_i32 = arith.constant 0 : i32
    %c0_i32_0 = arith.constant 0 : i32
    %c0_i32_1 = arith.constant 0 : i32
    return %c0_i32, %c0_i32_0 : i32, i32
  }
  func.func @transform_3(%arg0: i32) -> (i32, i32) {
    %c0_i32 = arith.constant 0 : i32
    %c0_i32_0 = arith.constant 0 : i32
    %c0_i32_1 = arith.constant 0 : i32
    return %c0_i32, %c0_i32_0 : i32, i32
  }
  func.func @transform_4(%arg0: i32) -> (i32, i32) {
    %c0_i32 = arith.constant 0 : i32
    %c0_i32_0 = arith.constant 0 : i32
    %c0_i32_1 = arith.constant 0 : i32
    return %c0_i32, %c0_i32_0 : i32, i32
  }
  func.func @transform_5(%arg0: i32) -> (i32, i32) {
    %c0_i32 = arith.constant 0 : i32
    %c0_i32_0 = arith.constant 0 : i32
    return %arg0, %c0_i32 : i32, i32
  }
}

</mosaic_0001>

<bundles_post_ra>
// kernel: tpu_custom_call.1
= control target key start
LH: loop header
LB: loop body
LE: loop exit
PB: predicated region body
PF: predicated region fallthrough
CT: control target
= control target key end

     0   :  { %10 = vsyncpa [#allocation3], 0  ;;  %s627_s0 = inlined_call_operand.vmem [shape: f32[8,4], index: 0, kind: input, shape index: {}]   ;;  %s628_s1 = inlined_call_operand.vmem [shape: bf16[4,128], index: 1, kind: input, shape index: {}]   ;;  %s629_s2 = inlined_call_operand.hbm [shape: bf16[128,128], index: 2, kind: input, shape index: {}]   ;;  %s630_s3 = inlined_call_operand.hbm [shape: bf16[128,128], index: 3, kind: input, shape index: {}]   ;;  %s631_s4 = inlined_call_operand.vmem [shape: f32[3,128], index: 4, kind: input, shape index: {}]   ;;  %s632_s5 = inlined_call_operand.hbm [shape: bf16[8,128], index: 5, kind: output, shape index: {}]  }
   0x1   :  { %11 = vsyncpa [#allocation6], 0 }
   0x2   :  { %12 = vsyncpa [#allocation4], 0  ;;  %s522_s18 = smov [#allocation2]   ;;  %s450_s22 = scalar_lea.hbm %s629_s2, 1024 }
   0x3   :  { %s22_s19 = sshll.u32 %s522_s18, 4  ;;  %p451_p0 = scmp.ne.s32.totalorder %s629_s2, %s450_s22  ;;  %s23_s19 = int_to_ptr.vmem [resolvable:$true] %s22_s19 }
   0x4   :  { %p454_p1 = scmp.lt.u32.totalorder %s450_s22, %s629_s2 }
   0x6   :  { %p456_p2 = pnand %p454_p1, %p451_p0 }
   0x8   :  { %459 = shalt.err (!%p456_p2)
}
   0x9   :  { %s460_s27 = scalar_lea.vmem %s23_s19, 1024  ;;  %p465_p4 = scmp.lt.s32.totalorder %s23_s19, %s23_s19 }
   0xa   :  { %p461_p3 = scmp.ne.s32.totalorder %s23_s19, %s460_s27  ;;  %p466_p5 = scmp.lt.s32.totalorder %s460_s27, %s460_s27 }
   0xc   :  { %p467_p6 = por %p466_p5, %p465_p4 }
   0xe   :  { %p468_p7 = pnand %p467_p6, %p461_p3 }
  0x10   :  { %471 = shalt.err (!%p468_p7)
}
  0x11   :  { %s523_s28 = smov 64   ;;  %s524_s29 = smov 4  }
  0x12   :  { %28 = dma.hbm_to_vmem [thread:$0]  %s629_s2, 1024, %s23_s19, [#allocation3], %s523_s28, %s523_s28, %s524_s29  }
  0x13   :  { %s525_s7 = smov [#allocation5]   ;;  %s472_s11 = scalar_lea.hbm %s630_s3, 1024 }
  0x14   :  { %s34_s8 = sshll.u32 %s525_s7, 4  ;;  %p473_p8 = scmp.ne.s32.totalorder %s630_s3, %s472_s11  ;;  %s35_s8 = int_to_ptr.vmem [resolvable:$true] %s34_s8 }
  0x15   :  { %p476_p9 = scmp.lt.u32.totalorder %s472_s11, %s630_s3 }
  0x17   :  { %p478_p10 = pnand %p476_p9, %p473_p8 }
  0x19   :  { %481 = shalt.err (!%p478_p10)
}
  0x1a   :  { %s482_s16 = scalar_lea.vmem %s35_s8, 1024  ;;  %p487_p12 = scmp.lt.s32.totalorder %s35_s8, %s35_s8 }
  0x1b   :  { %p483_p11 = scmp.ne.s32.totalorder %s35_s8, %s482_s16  ;;  %p488_p13 = scmp.lt.s32.totalorder %s482_s16, %s482_s16 }
  0x1d   :  { %p489_p0 = por %p488_p13, %p487_p12 }
  0x1f   :  { %p490_p1 = pnand %p489_p0, %p483_p11 }
  0x21   :  { %493 = shalt.err (!%p490_p1)
}
  0x22   :  { %40 = dma.hbm_to_vmem [thread:$0]  %s630_s3, 1024, %s35_s8, [#allocation6], %s523_s28, %s523_s28, %s524_s29  }
  0x23   :  { %516 = dma.done.wait [#allocation3], 1024  }
  0x24   :  { %517 = vsyncadd [#allocation3], 4294966272 }
  0x25   :  { %518 = dma.done.wait [#allocation6], 1024  }
  0x26   :  { %519 = vsyncadd [#allocation6], 4294966272  ;;  %v526_v0 = vmov 0.0   ;;  %vm527_vm0 = vmmov 0   ;;  %vm62_vm1 = vcmask 1041408   ;;  %v51_v2 = vld [vmem:[%s627_s0] sm:$0xff]  ;;  %v54_v19 = vlaneseq }
  0x27   :  { %381 = vmatprep.subr.bf16.mxu0 %v526_v0  ;;  %383 = vmatprep.mubr.msk.bf16.mxu0 %vm527_vm0, %v526_v0  ;;  %v53_v1 = vld [vmem:[%s628_s1] sm:$0x3]  ;;  %v52_v4 = vpack.c.bf16 %v51_v2, %v51_v2  ;;  %vm58_vm2 = vcmask 31744   ;;  %v435_v6 = vld [vmem:[#allocation2 + $0x8] sm:$0xff]   ;;  %v436_v7 = vld [vmem:[#allocation2 + $0x10] sm:$0xff]  }
  0x28   :  { %387 = vmatprep.subr.bf16.mxu1 %v526_v0  ;;  %403 = vmatprep.mubr.msk.bf16.mxu1 %vm527_vm0, %v526_v0  ;;  %v64_v3 = vsel %vm62_vm1, %v53_v1, 0  ;;  %v434_v5 = vld [vmem:[#allocation2] sm:$0xff]   ;;  %v437_v8 = vld [vmem:[#allocation2 + $0x18] sm:$0xff]   ;;  %v439_v10 = vld [vmem:[#allocation2 + $0x28] sm:$0xff]   ;;  %v55_v20 = vshrl.u32 %v54_v19, 7 }
  0x29   :  { %382 = vmatpush3.bf16.msra.mxu0 %v64_v3  ;;  %388 = vmatpush3.bf16.msra.mxu1 %v434_v5  ;;  %v438_v9 = vld [vmem:[#allocation2 + $0x20] sm:$0xff]   ;;  %v440_v11 = vld [vmem:[#allocation2 + $0x30] sm:$0xff]   ;;  %v441_v12 = vld [vmem:[#allocation2 + $0x38] sm:$0xff]  }
  0x2a   :  { %407 = vmatprep.subr.bf16.mxu0 %v526_v0  ;;  %389 = vmatprep.subr.bf16.mxu1 %v526_v0  ;;  %v442_v13 = vld [vmem:[#allocation5] sm:$0xff]   ;;  %v443_v14 = vld [vmem:[#allocation5 + $0x8] sm:$0xff]   ;;  %v444_v15 = vld [vmem:[#allocation5 + $0x10] sm:$0xff]   ;;  %v56_v21 = vsub.s32 0, %v55_v20  ;;  %v126_v33 = vsub.s32 1, %v55_v20  ;;  %v236_v42 = vsub.s32 2, %v55_v20 }
  0x2b   :  { %v445_v16 = vld [vmem:[#allocation5 + $0x18] sm:$0xff]   ;;  %v446_v17 = vld [vmem:[#allocation5 + $0x20] sm:$0xff]   ;;  %v447_v18 = vld [vmem:[#allocation5 + $0x28] sm:$0xff]  }
  0x2c   :  { %384 = vmatmul.mubr.msk.bf16.vlgmr.msra.gmra.mrb[0].mxu0 %vm58_vm2, %v52_v4  ;;  %v50_v22 = vld [vmem:[%s631_s4] sm:$0x7]  ;;  %v448_v31 = vld [vmem:[#allocation5 + $0x30] sm:$0xff]   ;;  %v449_v32 = vld [vmem:[#allocation5 + $0x38] sm:$0xff]   ;;  %s528_s4 = smov [#allocation7]  }
  0x2d   :  { %423 = vmatprep.mubr.msk.bf16.mxu0 %vm527_vm0, %v526_v0  ;;  %390 = vmatpush3.bf16.msra.mxu1 %v435_v6  ;;  %v57_v23 = vrot.slane %v50_v22, %v56_v21  ;;  %v127_v34 = vrot.slane %v50_v22, %v126_v33  ;;  %v237_v43 = vrot.slane %v50_v22, %v236_v42  ;;  %s334_s21 = sshll.u32 %s528_s4, 4  ;;  %s335_s21 = int_to_ptr.vmem [resolvable:$true] %s334_s21 }
  0x2e   :  { %391 = vmatprep.subr.bf16.mxu1 %v526_v0  ;;  %408 = vmatpush3.bf16.msra.mxu0 %v442_v13  ;;  %s494_s22 = scalar_lea.vmem %s335_s21, 64  ;;  %p499_p3 = scmp.lt.s32.totalorder %s335_s21, %s335_s21 }
  0x2f   :  { %409 = vmatprep.subr.bf16.mxu0 %v526_v0  ;;  %p495_p2 = scmp.ne.s32.totalorder %s335_s21, %s494_s22  ;;  %p500_p4 = scmp.lt.s32.totalorder %s494_s22, %s494_s22 }
  0x31   :  { %392 = vmatpush3.bf16.msra.mxu1 %v436_v7  ;;  %p501_p5 = por %p500_p4, %p499_p3 }
  0x32   :  { %393 = vmatprep.subr.bf16.mxu1 %v526_v0  ;;  %410 = vmatpush3.bf16.msra.mxu0 %v443_v14 }
  0x33   :  { %411 = vmatprep.subr.bf16.mxu0 %v526_v0  ;;  %p502_p6 = pnand %p501_p5, %p495_p2 }
  0x35   :  { %394 = vmatpush3.bf16.msra.mxu1 %v437_v8 }
  0x36   :  { %395 = vmatprep.subr.bf16.mxu1 %v526_v0  ;;  %412 = vmatpush3.bf16.msra.mxu0 %v444_v15 }
  0x37   :  { %413 = vmatprep.subr.bf16.mxu0 %v526_v0 }
  0x39   :  { %396 = vmatpush3.bf16.msra.mxu1 %v438_v9 }
  0x3a   :  { %397 = vmatprep.subr.bf16.mxu1 %v526_v0  ;;  %414 = vmatpush3.bf16.msra.mxu0 %v445_v16 }
  0x3b   :  { %415 = vmatprep.subr.bf16.mxu0 %v526_v0 }
  0x3d   :  { %398 = vmatpush3.bf16.msra.mxu1 %v439_v10 }
  0x3e   :  { %399 = vmatprep.subr.bf16.mxu1 %v526_v0  ;;  %416 = vmatpush3.bf16.msra.mxu0 %v446_v17 }
  0x3f   :  { %417 = vmatprep.subr.bf16.mxu0 %v526_v0 }
  0x41   :  { %400 = vmatpush3.bf16.msra.mxu1 %v440_v11 }
  0x42   :  { %401 = vmatprep.subr.bf16.mxu1 %v526_v0  ;;  %418 = vmatpush3.bf16.msra.mxu0 %v447_v18 }
  0x43   :  { %419 = vmatprep.subr.bf16.mxu0 %v526_v0 }
  0x45   :  { %402 = vmatpush3.bf16.msra.mxu1 %v441_v12 }
  0x46   :  { %420 = vmatpush3.bf16.msra.mxu0 %v448_v31 }
  0x47   :  { %421 = vmatprep.subr.bf16.mxu0 %v526_v0 }
  0x4a   :  { %422 = vmatpush3.bf16.msra.mxu0 %v449_v32 }
  0xff   :  { %v100_v24 = vpop.f32.mrb[0].mxu0 }
 0x100   :  { %v101_v25 = vadd.f32 %v100_v24, %v57_v23  ;;  %v385_v26 = vpop.f32.mrb[1].mxu0 }
 0x101   :  { %v103_v27 = vpop.f32.mrb[2].mxu0 }
 0x102   :  { %v106_v28 = vmax.f32 %v101_v25, 0.0  ;;  %v386_v29 = vpop.f32.mrb[3].mxu0 }
 0x104   :  { %v107_v30 = vpack.c.bf16 %v106_v28, %v106_v28 }
 0x106   :  { %404 = vmatmul.mubr.bf16.vlgmr.msra.gmra.mrb[0].mxu1 %v107_v30 }
 0x1d9   :  { %v210_v35 = vpop.f32.mrb[0].mxu1 }
 0x1da   :  { %v211_v36 = vadd.f32 %v210_v35, %v127_v34  ;;  %v405_v37 = vpop.f32.mrb[1].mxu1 }
 0x1db   :  { %v213_v38 = vpop.f32.mrb[2].mxu1 }
 0x1dc   :  { %v216_v39 = vmax.f32 %v211_v36, 0.0  ;;  %v406_v40 = vpop.f32.mrb[3].mxu1 }
 0x1de   :  { %v217_v41 = vpack.c.bf16 %v216_v39, %v216_v39 }
 0x1e0   :  { %424 = vmatmul.mubr.bf16.vlgmr.msra.gmra.mrb[4].mxu0 %v217_v41 }
 0x2b3   :  { %v320_v44 = vpop.f32.mrb[4].mxu0 }
 0x2b4   :  { %v321_v45 = vadd.f32 %v320_v44, %v237_v43  ;;  %v425_v46 = vpop.f32.mrb[5].mxu0 }
 0x2b5   :  { %v323_v47 = vpop.f32.mrb[6].mxu0 }
 0x2b6   :  { %v326_v48 = vpack.c.bf16 %v321_v45, %v321_v45  ;;  %v426_v49 = vpop.f32.mrb[7].mxu0 }
 0x2b8   :  { %327 = vst [vmem:[#allocation7] sm:$0xf] %v326_v48 }
 0x2b9   :  { %505 = shalt.err (!%p502_p6)
}
 0x2ba   :  { %s506_s25 = scalar_lea.hbm %s632_s5, 64 }
 0x2bb   :  { %p507_p7 = scmp.ne.s32.totalorder %s632_s5, %s506_s25  ;;  %p510_p8 = scmp.lt.u32.totalorder %s506_s25, %s632_s5 }
 0x2bd   :  { %p512_p9 = pnand %p510_p8, %p507_p7 }
 0x2bf   :  { %515 = shalt.err (!%p512_p9)
}
 0x2c0   :  { %337 = dma.vmem_to_hbm [thread:$0]  %s335_s21, 64, %s632_s5, [#allocation4]  }
 0x2c1   :  { %520 = dma.done.wait [#allocation4], 64  }
 0x2c2   :  { %521 = vsyncadd [#allocation4], 4294967232 }
 0x2c3   :  { %341 = vsyncpa [#allocation3], 1 }
 0x2c4   :  { %342 = vsyncpa [#allocation6], 1 }
 0x2c5   :  { %343 = vsyncpa [#allocation4], 1 }

</bundles_post_ra>
